<compile_context>
chip_gen: v5e
topology: v5e:2x2
jax: 0.10.0
libtpu: 0.0.40
codegen_flags: <defaults>
</compile_context>

<pallas_src>
import functools
import math

import jax
import jax.numpy as jnp
from jax.experimental import pallas as pl
from jax.experimental.pallas import tpu as pltpu


def _round_up(x, m):
    return (x + m - 1) // m * m


def _lora_kernel(x_ref, a_ref, b_ref, bias_ref, o_ref, *, scaling):
    # [TM, K] @ [K, R] -> [TM, R], accumulate in f32 on the MXU.
    xa = jnp.dot(x_ref[...], a_ref[...], preferred_element_type=jnp.float32)
    # Apply scaling on the small (TM, R) intermediate (R << N), then
    # [TM, R] @ [R, TN] -> [TM, TN] in f32.
    out = jnp.dot(xa * scaling, b_ref[...], preferred_element_type=jnp.float32)
    # f32 epilogue (bias add), single cast at the final store.
    o_ref[...] = (out + bias_ref[...]).astype(o_ref.dtype)


def lora_forward(x, lora_A, lora_B, bias, scaling):
    """x: [..., in_features] -> [..., out_features]."""
    *lead, K = x.shape
    M = 1
    for d in lead:
        M *= d
    R = lora_A.shape[1]
    N = lora_B.shape[1]

    x2d = x.reshape(M, K)
    bias2d = bias.reshape(1, N).astype(jnp.float32)

    x_bytes = x2d.dtype.itemsize
    out_bytes = x2d.dtype.itemsize

    # ---- N tile: lane-dense (multiple of 128) only if N is big & divisible.
    if N % 128 == 0 and N > 1024:
        TN = 512 if N % 512 == 0 else 128
    else:
        TN = N

    # ---- M tile: largest multiple of 8 (<=1024) fitting a ~32 MiB budget.
    # Count double buffers for every input/output tile (conservative).
    fixed = 2 * (K * R + R * TN + TN) * 4  # A, B, bias blocks (f32)
    budget = 32 * 1024 * 1024
    TM = 1024
    while TM > 8:
        need = 2 * TM * K * x_bytes + 2 * TM * TN * out_bytes + fixed
        if need <= budget:
            break
        TM //= 2
    TM = min(TM, _round_up(max(M, 1), 8))

    # Pad M so the grid divides evenly; padded rows are sliced off at the end.
    M_pad = _round_up(max(M, 1), TM)
    if M_pad != M:
        x2d = jnp.pad(x2d, ((0, M_pad - M), (0, 0)))

    grid = (M_pad // TM, N // TN)

    vmem_need = 2 * TM * K * x_bytes + 2 * TM * TN * out_bytes + fixed
    vmem_limit = int(min(max(2 * vmem_need, 16 * 1024 * 1024),
                         48 * 1024 * 1024))  # stays within v7x's 64 MiB VMEM

    kernel = functools.partial(_lora_kernel, scaling=scaling)

    out2d = pl.pallas_call(
        kernel,
        out_shape=jax.ShapeDtypeStruct((M_pad, N), x.dtype),
        grid_spec=pltpu.PrefetchScalarGridSpec(
            num_scalar_prefetch=0,
            grid=grid,
            in_specs=[
                pl.BlockSpec((TM, K), lambda i, j: (i, 0)),   # x: pipelined over M
                pl.BlockSpec((K, R), lambda i, j: (0, 0)),    # A: VMEM-resident
                pl.BlockSpec((R, TN), lambda i, j: (0, j)),   # B: resident / N-tiled
                pl.BlockSpec((1, TN), lambda i, j: (0, j)),   # bias
            ],
            out_specs=pl.BlockSpec((TM, TN), lambda i, j: (i, j)),
        ),
        compiler_params=pltpu.CompilerParams(
            dimension_semantics=("parallel", "parallel"),
            vmem_limit_bytes=vmem_limit,
        ),
        cost_estimate=pl.CostEstimate(
            flops=2 * M * R * (K + N),
            bytes_accessed=(M * K + M * N) * x_bytes + (K * R + R * N + N) * 4,
            transcendentals=0,
        ),
    )(x2d, lora_A, lora_B, bias2d)

    return out2d[:M].reshape(*lead, N)


def init_lora_params(key, in_features, out_features, rank):
    """Deterministic init mirroring the PyTorch module's __init__.

    The PyTorch module applies kaiming_uniform_(a=sqrt(5)) to BOTH lora_A and
    lora_B (it does not zero B like canonical LoRA), so we mirror that.
    For a 2-D tensor [d0, d1], fan_in = d1 and bound = sqrt(1 / fan_in).
    """
    kA, kB = jax.random.split(key)
    bound_A = math.sqrt(1.0 / rank)          # fan_in of lora_A [in, rank] is rank
    bound_B = math.sqrt(1.0 / out_features)  # fan_in of lora_B [rank, out] is out
    lora_A = jax.random.uniform(
        kA, (in_features, rank), jnp.float32, -bound_A, bound_A)
    lora_B = jax.random.uniform(
        kB, (rank, out_features), jnp.float32, -bound_B, bound_B)
    bias = jnp.zeros((out_features,), jnp.float32)
    return lora_A, lora_B, bias


if __name__ == "__main__":
    in_features = 32
    out_features = 32
    rank = 4
    alpha = 8
    scaling = alpha / rank

    key = jax.random.PRNGKey(0)
    k_params, k_x = jax.random.split(key)
    lora_A, lora_B, bias = init_lora_params(k_params, in_features, out_features, rank)

    # x: [batch=2, seq=8, hidden=32]
    x = jax.random.normal(k_x, (2, 8, in_features), jnp.float32)

    y = lora_forward(x, lora_A, lora_B, bias, scaling)
    y = jax.block_until_ready(y)

    # Pure-JAX reference check.
    y_ref = x @ lora_A @ lora_B * scaling + bias
    assert y.shape == (2, 8, out_features)
    assert jnp.allclose(y, y_ref, atol=1e-5, rtol=1e-5), "mismatch vs reference"

    print("KERNEL_OK")
</pallas_src>

<mosaic_0001>
module attributes {stable_mosaic.version = 11 : i64} {
  func.func @_lora_kernel(%arg0: i32, %arg1: i32, %arg2: memref<16x32xf32, #tpu.memory_space<vmem>>, %arg3: memref<32x4xf32, #tpu.memory_space<vmem>>, %arg4: memref<4x32xf32, #tpu.memory_space<vmem>>, %arg5: memref<1x32xf32, #tpu.memory_space<vmem>>, %arg6: memref<16x32xf32, #tpu.memory_space<vmem>>) attributes {dimension_semantics = [#tpu.dimension_semantics<parallel>, #tpu.dimension_semantics<parallel>], iteration_bounds = array<i64: 1, 1>, scalar_prefetch = 0 : i64, scratch_operands = 0 : i64, tpu.core_type = #tpu.core_type<tc>, window_params = [{transform_indices = @transform_0, window_bounds = array<i64: 16, 32>}, {pipeline_mode = #tpu.pipeline_mode<synchronous>, transform_indices = @transform_1, window_bounds = array<i64: 32, 4>}, {transform_indices = @transform_2, window_bounds = array<i64: 4, 32>}, {transform_indices = @transform_3, window_bounds = array<i64: 1, 32>}, {transform_indices = @transform_4, window_bounds = array<i64: 16, 32>}]} {
    %c0 = arith.constant 0 : index
    %c0_0 = arith.constant 0 : index
    %0 = vector.load %arg2[%c0, %c0_0] : memref<16x32xf32, #tpu.memory_space<vmem>>, vector<16x32xf32>
    %c0_1 = arith.constant 0 : index
    %c0_2 = arith.constant 0 : index
    %1 = vector.load %arg3[%c0_1, %c0_2] : memref<32x4xf32, #tpu.memory_space<vmem>>, vector<32x4xf32>
    %cst = arith.constant dense<0.000000e+00> : vector<16x4xf32>
    %2 = tpu.matmul %0, %1, %cst {dimension_numbers = #tpu.dot_dimension_numbers<[1], [0], [0], [1], [0, 0, 1, 1], [], []>} : vector<16x32xf32>, vector<32x4xf32>, vector<16x4xf32> -> vector<16x4xf32>
    %cst_3 = arith.constant 2.000000e+00 : f32
    %3 = vector.broadcast %cst_3 : f32 to vector<16x4xf32>
    %4 = arith.mulf %2, %3 : vector<16x4xf32>
    %c0_4 = arith.constant 0 : index
    %c0_5 = arith.constant 0 : index
    %5 = vector.load %arg4[%c0_4, %c0_5] : memref<4x32xf32, #tpu.memory_space<vmem>>, vector<4x32xf32>
    %cst_6 = arith.constant dense<0.000000e+00> : vector<16x32xf32>
    %6 = tpu.matmul %4, %5, %cst_6 {dimension_numbers = #tpu.dot_dimension_numbers<[1], [0], [0], [1], [0, 0, 1, 1], [], []>} : vector<16x4xf32>, vector<4x32xf32>, vector<16x32xf32> -> vector<16x32xf32>
    %c0_7 = arith.constant 0 : index
    %c0_8 = arith.constant 0 : index
    %7 = vector.load %arg5[%c0_7, %c0_8] : memref<1x32xf32, #tpu.memory_space<vmem>>, vector<1x32xf32>
    %8 = vector.broadcast %7 : vector<1x32xf32> to vector<16x32xf32>
    %9 = arith.addf %6, %8 : vector<16x32xf32>
    %c0_9 = arith.constant 0 : index
    %c0_10 = arith.constant 0 : index
    %10 = vector.load %arg6[%c0_9, %c0_10] : memref<16x32xf32, #tpu.memory_space<vmem>>, vector<16x32xf32>
    tpu.vector_store %arg6[%c0_9, %c0_10], %9 {strides = array<i32>} : memref<16x32xf32, #tpu.memory_space<vmem>>, vector<16x32xf32>,
    return
  }
  func.func @transform_0(%arg0: i32, %arg1: i32) -> (i32, i32) {
    %c0_i32 = arith.constant 0 : i32
    %c0_i32_0 = arith.constant 0 : i32
    return %arg0, %c0_i32 : i32, i32
  }
  func.func @transform_1(%arg0: i32, %arg1: i32) -> (i32, i32) {
    %c0_i32 = arith.constant 0 : i32
    %c0_i32_0 = arith.constant 0 : i32
    %c0_i32_1 = arith.constant 0 : i32
    return %c0_i32, %c0_i32_0 : i32, i32
  }
  func.func @transform_2(%arg0: i32, %arg1: i32) -> (i32, i32) {
    %c0_i32 = arith.constant 0 : i32
    %c0_i32_0 = arith.constant 0 : i32
    return %c0_i32, %arg1 : i32, i32
  }
  func.func @transform_3(%arg0: i32, %arg1: i32) -> (i32, i32) {
    %c0_i32 = arith.constant 0 : i32
    %c0_i32_0 = arith.constant 0 : i32
    return %c0_i32, %arg1 : i32, i32
  }
  func.func @transform_4(%arg0: i32, %arg1: i32) -> (i32, i32) {
    %c0_i32 = arith.constant 0 : i32
    return %arg0, %arg1 : i32, i32
  }
}

</mosaic_0001>

<bundles_post_ra>
// kernel: tpu_custom_call.1
= control target key start
LH: loop header
LB: loop body
LE: loop exit
PB: predicated region body
PF: predicated region fallthrough
CT: control target
= control target key end

     0   :  { %s214_s0 = inlined_call_operand.vmem [shape: f32[16,32], index: 0, kind: input, shape index: {}]   ;;  %s215_s1 = inlined_call_operand.vmem [shape: f32[32,4], index: 1, kind: input, shape index: {}]   ;;  %s216_s2 = inlined_call_operand.vmem [shape: f32[4,32], index: 2, kind: input, shape index: {}]   ;;  %s217_s3 = inlined_call_operand.vmem [shape: f32[1,32], index: 3, kind: input, shape index: {}]   ;;  %s218_s4 = inlined_call_operand.hbm [shape: f32[16,32], index: 4, kind: output, shape index: {}]  }
   0x1   :  { %v23_v0 = vld [vmem:[%s215_s1 + $0x18] sm:$0xff]  ;;  %v22_v1 = vld [vmem:[%s215_s1 + $0x10] sm:$0xff]  ;;  %v21_v2 = vld [vmem:[%s215_s1 + $0x8] sm:$0xff] }
   0x2   :  { %120 = vmatpush.msra.mxu2 %v23_v0  ;;  %43 = vmatpush.msra.mxu0 %v23_v0 }
   0x3   :  { %9 = vsyncpa [#allocation3], 0  ;;  %v20_v3 = vld [vmem:[%s215_s1] sm:$0xff]  ;;  %v19_v4 = vld [vmem:[%s214_s0 + $0x8] sm:$0xff]  ;;  %vm24_vm0 = vcmask 261120   ;;  %vm68_vm1 = vcmask 1043456  }
   0x4   :  { %121 = vmatpush.msra.mxu2 %v22_v1  ;;  %44 = vmatpush.msra.mxu0 %v22_v1  ;;  %v18_v5 = vld [vmem:[%s214_s0] sm:$0xff]  ;;  %vm61_vm2 = vcmask 31744   ;;  %s155_s29 = smov [#allocation2]   ;;  %s103_s6 = sshll.u32 %s218_s4, 4  ;;  %s104_s6 = int_to_ptr.hbm [resolvable:$true] %s103_s6 }
   0x5   :  { %v56_v6 = vld [vmem:[%s216_s2] sm:$0xf]  ;;  %s101_s2 = sshll.u32 %s155_s29, 4  ;;  %s156_s7 = smov 128   ;;  %s102_s2 = int_to_ptr.vmem [resolvable:$true] %s101_s2 }
   0x6   :  { %122 = vmatpush.msra.mxu2 %v21_v2  ;;  %45 = vmatpush.msra.mxu0 %v21_v2  ;;  %v128_v11 = vld [vmem:[%s217_s3] ss:$0 sm:$0xff]  ;;  %s157_s8 = smov 8  }
   0x7   :  { %124 = vmatpush.msk.msra.mxu3 %vm68_vm1, %v56_v6  ;;  %117 = vmatpush.msk.msra.mxu1 %vm68_vm1, %v56_v6 }
   0x8   :  { %123 = vmatpush.msra.mxu2 %v20_v3  ;;  %46 = vmatpush.msra.mxu0 %v20_v3 }
   0x9   :  { %116 = vmatmul.msk.f32.vlgmr.msra.gmra.mxu2 %vm24_vm0, %v19_v4  ;;  %115 = vmatmul.msk.f32.vlgmr.msra.gmra.mxu0 %vm24_vm0, %v18_v5 }
  0x86   :  { %v48_v7 = vpop.f32.mrf.mxu0 }
  0x87   :  { %v54_v8 = vmul.f32 2.0, %v48_v7 }
  0x89   :  { %118 = vmatmul.msk.f32.vlgmr.msra.gmra.mxu1 %vm61_vm2, %v54_v8 }
  0x8c   :  { %v51_v9 = vpop.f32.mrf.mxu2 }
  0x8d   :  { %v55_v10 = vmul.f32 2.0, %v51_v9 }
  0x8f   :  { %119 = vmatmul.msk.f32.vlgmr.msra.gmra.mxu3 %vm61_vm2, %v55_v10 }
 0x106   :  { %v89_v12 = vpop.f32.mrf.mxu1 }
 0x107   :  { %v90_v13 = vadd.f32 %v128_v11, %v89_v12 }
 0x109   :  { %95 = vst.msk [vmem:[#allocation2] sm:$0xff] %vm24_vm0, %v90_v13 }
 0x112   :  { %v92_v14 = vpop.f32.mrf.mxu3 }
 0x113   :  { %v93_v15 = vadd.f32 %v128_v11, %v92_v14 }
 0x115   :  { %96 = vst.msk [vmem:[#allocation2 + $0x8] sm:$0xff] %vm24_vm0, %v93_v15 }
 0x116   :  { %109 = dma.vmem_to_hbm [thread:$0]  %s102_s2, 256, %s104_s6, [#allocation3], %s156_s7, %s156_s7, %s157_s8  }
 0x117   :  { %153 = dma.done.wait [#allocation3], 256  }
 0x118   :  { %154 = vsyncadd [#allocation3], 4294967040 }
 0x119   :  { %114 = vsyncpa [#allocation3], 1 }

</bundles_post_ra>
